<compile_context>
chip_gen: v6e
topology: v6e:2x2x1
jax: 0.10.0
libtpu: 0.0.40
codegen_flags: <defaults>
</compile_context>

<pallas_src>
import functools

import jax
import jax.numpy as jnp
from jax.experimental import pallas as pl
from jax.experimental.pallas import tpu as pltpu


def _device_config():
    """Returns (tanh_dtype, tile_bytes, vmem_limit_bytes) for the local TPU."""
    kind = ""
    try:
        kind = jax.devices()[0].device_kind.lower()
    except Exception:
        pass
    if any(old in kind for old in ("v2", "v3", "v4", "v5")):
        # No bf16 EUP/VPU; 128 MiB physical VMEM (16 MiB default scoped limit).
        return jnp.float32, 2 << 20, 64 << 20
    if "v6" in kind:
        # bf16 EUP; 128 MiB physical VMEM.
        return jnp.bfloat16, 6 << 20, 64 << 20
    # v7x (and unknown/newer): 64 MiB physical VMEM -> keep headroom.
    return jnp.bfloat16, 4 << 20, 48 << 20


def _attention_kernel(x_ref, wmat_ref, emat_ref, o_ref, *, tanh_dtype):
    # x_ref:    (Bt, S*D)  lane-dense tile of x
    # wmat_ref: (S*D, S)   bf16, wmat[s*D + d, t] = w[d] * (s == t)
    # emat_ref: (S,  S*D)  bf16, emat[t, s*D + d] = (s == t)
    x = x_ref[...]

    # tanh on the EUP (bf16 on v6e/v7x, f32 on v5e and older).
    m = jnp.tanh(x.astype(tanh_dtype))

    # scores[b, s] = sum_d tanh(x)[b, s, d] * w[d] — segmented reduction on the MXU.
    # bf16 operands (f32 accumulation) halve the vmatmul push count.
    scores = jax.lax.dot_general(
        m.astype(jnp.bfloat16), wmat_ref[...],
        dimension_numbers=(((1,), (0,)), ((), ())),
        preferred_element_type=jnp.float32)                      # (Bt, S)

    # Softmax over the sequence axis (dim=1 of the original (B, S, D) layout).
    scores = scores - jnp.max(scores, axis=-1, keepdims=True)
    e = jnp.exp(scores)
    alpha = e * pl.reciprocal(jnp.sum(e, axis=-1, keepdims=True), approx=True)

    # Broadcast alpha[b, s] across its D lanes with a 0/1 matmul (bf16 MXU pushes).
    alpha_full = jax.lax.dot_general(
        alpha.astype(jnp.bfloat16), emat_ref[...],
        dimension_numbers=(((1,), (0,)), ((), ())),
        preferred_element_type=jnp.float32)                      # (Bt, S*D)

    # Multiply in x.dtype: no f32 up-cast copy of x; alpha_full down-cast if x is bf16.
    o_ref[...] = (x * alpha_full.astype(x.dtype)).astype(o_ref.dtype)


def attention_forward(x, w, *, compute_dtype=None, block_rows=None,
                      tile_bytes=None, vmem_limit_bytes=None):
    """x: (B, S, D), w: (D,) -> (B, S, D).  Same semantics as the PyTorch forward."""
    B, S, D = x.shape
    assert w.shape == (D,), f"w must have shape ({D},), got {w.shape}"

    dev_tanh_dtype, dev_tile_bytes, dev_vmem = _device_config()
    tanh_dtype = dev_tanh_dtype if compute_dtype is None else compute_dtype
    tile_bytes = dev_tile_bytes if tile_bytes is None else int(tile_bytes)
    vmem_limit_bytes = dev_vmem if vmem_limit_bytes is None else int(vmem_limit_bytes)

    SD = S * D
    # Lane-dense view: fold (S, D) into one trailing axis (free row-major reshape).
    x2 = x.reshape(B, SD)

    # Constant helper operands (tiny; DMA'd once — constant index_map), bf16 always:
    #   wmat[s*D + d, t] = w[d] * (s == t)   -> scores = tanh(x2) @ wmat   (per-row M @ w)
    #   emat[t, s*D + d] = (s == t)          -> alpha_full = alpha @ emat  (broadcast over D)
    eye_s = jnp.eye(S, dtype=jnp.float32)
    wmat = jnp.kron(eye_s, w.astype(jnp.float32).reshape(D, 1)).astype(jnp.bfloat16)
    emat = jnp.kron(eye_s, jnp.ones((1, D), jnp.float32)).astype(jnp.bfloat16)

    # Row-tile size: target ~tile_bytes per x tile, rounded to the sublane multiple.
    row_bytes = SD * x.dtype.itemsize
    if block_rows is None:
        bt = max(1, tile_bytes // max(row_bytes, 1))
    else:
        bt = max(1, int(block_rows))
    bt = min(bt, B)
    if bt < B:
        # (8, 128) rule: second-to-last block dim must be a multiple of 8 unless it
        # equals the full array extent.
        bt = max(8, (bt // 8) * 8)
        bt = min(bt, B)

    # No padding: B % bt != 0 is handled by Pallas's ragged edge blocks.  Rows are
    # independent, so garbage in out-of-bounds input rows stays in those rows, and
    # the out-of-bounds portion of the output store is masked.
    grid = (pl.cdiv(B, bt),)

    kernel = functools.partial(_attention_kernel, tanh_dtype=tanh_dtype)

    out2 = pl.pallas_call(
        kernel,
        out_shape=jax.ShapeDtypeStruct((B, SD), x.dtype),
        grid_spec=pltpu.PrefetchScalarGridSpec(
            num_scalar_prefetch=0,
            grid=grid,
            in_specs=[
                pl.BlockSpec((bt, SD), lambda b: (b, 0)),   # lane-dense x tile
                pl.BlockSpec((SD, S), lambda b: (0, 0)),    # shared score weights
                pl.BlockSpec((S, SD), lambda b: (0, 0)),    # shared broadcast matrix
            ],
            out_specs=pl.BlockSpec((bt, SD), lambda b: (b, 0)),
        ),
        compiler_params=pltpu.CompilerParams(
            dimension_semantics=("parallel",),   # megacore shards batch tiles
            vmem_limit_bytes=vmem_limit_bytes,
        ),
    )(x2, wmat, emat)

    return out2.reshape(B, S, D)


def _reference(x, w):
    m = jnp.tanh(x)
    scores = jnp.einsum("bsd,d->bs", m, w)
    alpha = jax.nn.softmax(scores, axis=1)[..., None]
    return x * alpha


if __name__ == "__main__":
    # Shapes consistent with the module: embedding_dim=16 -> feature dim D=32.
    B, S, embedding_dim = 2, 8, 16
    D = 2 * embedding_dim

    key = jax.random.PRNGKey(0)
    kx, kw = jax.random.split(key)
    x = jax.random.normal(kx, (B, S, D), dtype=jnp.float32)
    # nn.Parameter(torch.randn(...)).data.normal_(mean=0.0, std=0.05)
    w = 0.05 * jax.random.normal(kw, (D,), dtype=jnp.float32)

    out = jax.block_until_ready(attention_forward(x, w))
    ref = _reference(x, w)
    # Tolerance covers bf16 tanh / bf16 MXU operands and the approximate reciprocal.
    tol = 1e-2
    assert jnp.allclose(out, ref, atol=tol, rtol=tol), "mismatch vs reference (small)"

    # Larger, non-tile-divisible batch: exercises the multi-step grid and the
    # ragged (masked) final block instead of a pad/crop round-trip.
    xb = jax.random.normal(jax.random.PRNGKey(1), (37, S, D), dtype=jnp.float32)
    outb = jax.block_until_ready(attention_forward(xb, w, block_rows=8))
    refb = _reference(xb, w)
    assert jnp.allclose(outb, refb, atol=tol, rtol=tol), "mismatch vs reference (batched)"
    assert jnp.all(jnp.isfinite(outb)), "non-finite values leaked from ragged edge block"

    print("KERNEL_OK")
</pallas_src>

<mosaic_0001>
module attributes {stable_mosaic.version = 11 : i64} {
  func.func @_attention_kernel(%arg0: i32, %arg1: memref<2x256xf32, #tpu.memory_space<vmem>>, %arg2: memref<256x8xbf16, #tpu.memory_space<vmem>>, %arg3: memref<8x256xbf16, #tpu.memory_space<vmem>>, %arg4: memref<2x256xf32, #tpu.memory_space<vmem>>) attributes {dimension_semantics = [#tpu.dimension_semantics<parallel>], iteration_bounds = array<i64: 1>, scalar_prefetch = 0 : i64, scratch_operands = 0 : i64, tpu.core_type = #tpu.core_type<tc>, window_params = [{transform_indices = @transform_0, window_bounds = array<i64: 2, 256>}, {pipeline_mode = #tpu.pipeline_mode<synchronous>, transform_indices = @transform_1, window_bounds = array<i64: 256, 8>}, {pipeline_mode = #tpu.pipeline_mode<synchronous>, transform_indices = @transform_2, window_bounds = array<i64: 8, 256>}, {transform_indices = @transform_3, window_bounds = array<i64: 2, 256>}]} {
    %c0 = arith.constant 0 : index
    %c0_0 = arith.constant 0 : index
    %0 = vector.load %arg1[%c0, %c0_0] : memref<2x256xf32, #tpu.memory_space<vmem>>, vector<2x256xf32>
    %1 = arith.truncf %0 : vector<2x256xf32> to vector<2x256xbf16>
    %2 = math.tanh %1 : vector<2x256xbf16>
    %c0_1 = arith.constant 0 : index
    %c0_2 = arith.constant 0 : index
    %3 = vector.load %arg2[%c0_1, %c0_2] : memref<256x8xbf16, #tpu.memory_space<vmem>>, vector<256x8xbf16>
    %cst = arith.constant dense<0.000000e+00> : vector<2x8xf32>
    %4 = tpu.matmul %2, %3, %cst {dimension_numbers = #tpu.dot_dimension_numbers<[1], [0], [0], [1], [0, 0, 1, 1], [], []>} : vector<2x256xbf16>, vector<256x8xbf16>, vector<2x8xf32> -> vector<2x8xf32>
    %cst_3 = arith.constant dense<0xFF800000> : vector<2xf32>
    %5 = vector.multi_reduction <maximumf>, %4, %cst_3 [1] : vector<2x8xf32> to vector<2xf32>
    %6 = vector.shape_cast %5 : vector<2xf32> to vector<2x1xf32>
    %7 = vector.broadcast %6 : vector<2x1xf32> to vector<2x8xf32>
    %8 = arith.subf %4, %7 : vector<2x8xf32>
    %9 = math.exp %8 : vector<2x8xf32>
    %cst_4 = arith.constant dense<0.000000e+00> : vector<2xf32>
    %10 = vector.multi_reduction <add>, %9, %cst_4 [1] : vector<2x8xf32> to vector<2xf32>
    %11 = vector.shape_cast %10 : vector<2xf32> to vector<2x1xf32>
    %12 = tpu.reciprocal %11 {approx = true} : vector<2x1xf32> -> vector<2x1xf32>
    %13 = vector.broadcast %12 : vector<2x1xf32> to vector<2x8xf32>
    %14 = arith.mulf %9, %13 : vector<2x8xf32>
    %15 = arith.truncf %14 : vector<2x8xf32> to vector<2x8xbf16>
    %c0_5 = arith.constant 0 : index
    %c0_6 = arith.constant 0 : index
    %16 = vector.load %arg3[%c0_5, %c0_6] : memref<8x256xbf16, #tpu.memory_space<vmem>>, vector<8x256xbf16>
    %cst_7 = arith.constant dense<0.000000e+00> : vector<2x256xf32>
    %17 = tpu.matmul %15, %16, %cst_7 {dimension_numbers = #tpu.dot_dimension_numbers<[1], [0], [0], [1], [0, 0, 1, 1], [], []>} : vector<2x8xbf16>, vector<8x256xbf16>, vector<2x256xf32> -> vector<2x256xf32>
    %18 = arith.mulf %0, %17 : vector<2x256xf32>
    %c0_8 = arith.constant 0 : index
    %c0_9 = arith.constant 0 : index
    %19 = vector.load %arg4[%c0_8, %c0_9] : memref<2x256xf32, #tpu.memory_space<vmem>>, vector<2x256xf32>
    tpu.vector_store %arg4[%c0_8, %c0_9], %18 {strides = array<i32>} : memref<2x256xf32, #tpu.memory_space<vmem>>, vector<2x256xf32>,
    return
  }
  func.func @transform_0(%arg0: i32) -> (i32, i32) {
    %c0_i32 = arith.constant 0 : i32
    %c0_i32_0 = arith.constant 0 : i32
    return %arg0, %c0_i32 : i32, i32
  }
  func.func @transform_1(%arg0: i32) -> (i32, i32) {
    %c0_i32 = arith.constant 0 : i32
    %c0_i32_0 = arith.constant 0 : i32
    %c0_i32_1 = arith.constant 0 : i32
    return %c0_i32, %c0_i32_0 : i32, i32
  }
  func.func @transform_2(%arg0: i32) -> (i32, i32) {
    %c0_i32 = arith.constant 0 : i32
    %c0_i32_0 = arith.constant 0 : i32
    %c0_i32_1 = arith.constant 0 : i32
    return %c0_i32, %c0_i32_0 : i32, i32
  }
  func.func @transform_3(%arg0: i32) -> (i32, i32) {
    %c0_i32 = arith.constant 0 : i32
    %c0_i32_0 = arith.constant 0 : i32
    return %arg0, %c0_i32 : i32, i32
  }
}

</mosaic_0001>

<bundles_post_ra>
// kernel: tpu_custom_call.1
= control target key start
LH: loop header
LB: loop body
LE: loop exit
PB: predicated region body
PF: predicated region fallthrough
CT: control target
= control target key end

     0   :  { %v21_v9 = vlaneseq  ;;  %s471_s0 = inlined_call_operand.vmem [shape: f32[2,256], index: 0, kind: input, shape index: {}]   ;;  %s472_s1 = inlined_call_operand.vmem [shape: bf16[256,8], index: 1, kind: input, shape index: {}]   ;;  %s473_s2 = inlined_call_operand.vmem [shape: bf16[8,256], index: 2, kind: input, shape index: {}]   ;;  %s474_s3 = inlined_call_operand.hbm [shape: f32[2,256], index: 3, kind: output, shape index: {}]  }
   0x1   :  { %v343_v0 = vld [vmem:[%s472_s1 + $0x78] sm:$0xff]   ;;  %v345_v2 = vld [vmem:[%s472_s1 + $0x70] sm:$0xff]   ;;  %v347_v4 = vld [vmem:[%s472_s1 + $0x68] sm:$0xff]  }
   0x2   :  { %v344_v1 = vld [vmem:[%s472_s1 + $0x38] sm:$0xff]   ;;  %318 = vmatprep.subr.bf16.mxu0 %v343_v0  ;;  %v346_v3 = vld [vmem:[%s472_s1 + $0x30] sm:$0xff]   ;;  %v348_v5 = vld [vmem:[%s472_s1 + $0x28] sm:$0xff]  }
   0x3   :  { %319 = vmatpush3.bf16.msra.mxu0 %v344_v1  ;;  %v349_v6 = vld [vmem:[%s472_s1 + $0x60] sm:$0xff]   ;;  %v351_v8 = vld [vmem:[%s472_s1 + $0x58] sm:$0xff]   ;;  %v353_v11 = vld [vmem:[%s472_s1 + $0x50] sm:$0xff]  }
   0x4   :  { %320 = vmatprep.subr.bf16.mxu0 %v345_v2  ;;  %v350_v7 = vld [vmem:[%s472_s1 + $0x20] sm:$0xff]   ;;  %v352_v10 = vld [vmem:[%s472_s1 + $0x18] sm:$0xff]  }
   0x7   :  { %321 = vmatpush3.bf16.msra.mxu0 %v346_v3 }
   0x8   :  { %322 = vmatprep.subr.bf16.mxu0 %v347_v4 }
   0xb   :  { %323 = vmatpush3.bf16.msra.mxu0 %v348_v5 }
   0xc   :  { %324 = vmatprep.subr.bf16.mxu0 %v349_v6 }
   0xf   :  { %325 = vmatpush3.bf16.msra.mxu0 %v350_v7 }
  0x10   :  { %326 = vmatprep.subr.bf16.mxu0 %v351_v8 }
  0x11   :  { %8 = vsyncpa [#allocation3], 0  ;;  %v391_v12 = vmov 1983009808   ;;  %v22_v14 = vshrl.u32 %v21_v9, 7  ;;  %v354_v15 = vld [vmem:[%s472_s1 + $0x10] sm:$0xff]  }
  0x12   :  { %v19_v13 = vunpack.c.l.s4 %v391_v12  ;;  %v355_v17 = vld [vmem:[%s472_s1 + $0x48] sm:$0xff]   ;;  %v16_v18 = vld [vmem:[%s471_s0] sm:$0xf]  ;;  %vm200_vm0 = vcmask 58368   ;;  %vm223_vm1 = vcmask 1043456   ;;  %v392_v43 = vmov 0  }
  0x13   :  { %327 = vmatpush3.bf16.msra.mxu0 %v352_v10  ;;  %v356_v20 = vld [vmem:[%s472_s1 + $0x8] sm:$0xff]   ;;  %v357_v22 = vld [vmem:[%s472_s1 + $0x40] sm:$0xff]   ;;  %262 = vmatprep.mubr.bf16.mxu1 %v392_v43  ;;  %vm219_vm2 = vcmask 64512  }
  0x14   :  { %v20_v16 = vunpack.c.0.s8 %v19_v13  ;;  %328 = vmatprep.subr.bf16.mxu0 %v353_v11  ;;  %v358_v25 = vld [vmem:[%s472_s1] sm:$0xff]  }
  0x15   :  { %v213_v40 = vld [vmem:[%s473_s2] sm:$0xff]  ;;  %s393_s2 = smov [#allocation2]  }
  0x16   :  { %v23_v19 = vsub.s32 %v20_v16, %v22_v14  ;;  %v315_v41 = vcombine.high %v213_v40, %v213_v40  ;;  %v314_v42 = vcombine.low %v213_v40, %v213_v40  ;;  %s290_s19 = sshll.u32 %s393_s2, 4  ;;  %s291_s19 = int_to_ptr.vmem [resolvable:$true] %s290_s19 }
  0x17   :  { %329 = vmatpush3.bf16.msra.mxu0 %v354_v15  ;;  %s369_s20 = scalar_lea.vmem %s291_s19, 64  ;;  %p374_p1 = scmp.lt.s32.totalorder %s291_s19, %s291_s19 }
  0x18   :  { %v24_v21 = vrot.slane %v16_v18, %v23_v19  ;;  %330 = vmatprep.subr.bf16.mxu0 %v355_v17  ;;  %316 = vmatprep.subr.msk.bf16.mxu1 %vm223_vm1, %v315_v41  ;;  %v225_v44 = vsel %vm223_vm1, %v314_v42, 0  ;;  %p370_p0 = scmp.ne.s32.totalorder %s291_s19, %s369_s20  ;;  %p375_p2 = scmp.lt.s32.totalorder %s369_s20, %s369_s20 }
  0x19   :  { %245 = vmatpush1.bf16.msra.mxu1 %v225_v44 }
  0x1a   :  { %v25_v23 = vcombine.high %v24_v21, %v24_v21  ;;  %v28_v24 = vpack.c.bf16 %v24_v21, %v24_v21  ;;  %p376_p3 = por %p375_p2, %p374_p1 }
  0x1b   :  { %331 = vmatpush3.bf16.msra.mxu0 %v356_v20 }
  0x1c   :  { %v29_v26 = vpack.c.bf16 %v25_v23, %v25_v23  ;;  %332 = vmatprep.subr.bf16.mxu0 %v357_v22  ;;  %361 = vtanh.bf16 %v28_v24  ;;  %p377_p4 = pnand %p376_p3, %p370_p0 }
  0x1e   :  { %363 = vtanh.bf16 %v29_v26 }
  0x1f   :  { %333 = vmatpush3.bf16.msra.mxu0 %v358_v25 }
  0x2a   :  { %v362_v27 = vpop.eup %361 }
  0x2c   :  { %v364_v28 = vpop.eup %363 }
  0x2d   :  { %192 = vmatprep.mubr.bf16.mxu0 %v364_v28 }
  0x2e   :  { %193 = vmatmul.mubr.bf16.vlgmr.msra.gmra.mxu0 %v362_v27 }
  0xee   :  { %v334_v29 = vpop.f32.mrf.mxu0 }
  0xf0   :  { %v335_v30 = vpop.f32.mrf.mxu0 }
  0xf1   :  { %v336_v31 = vadd.f32 %v335_v30, %v334_v29 }
  0xf2   :  { %v337_v32 = vpop.f32.mrf.mxu0 }
  0xf3   :  { %v201_v33 = vsel %vm200_vm0, %v336_v31, -inf }
  0xf4   :  { %v338_v34 = vpop.f32.mrf.mxu0  ;;  %202 = vmax.xlane.f32.xlu0 %v201_v33 }
 0x17d   :  { %v203_v35 = vpop.xlane.xlu0 %202 }
 0x17e   :  { %v204_v36 = vsub.f32 %v336_v31, %v203_v35 }
 0x180   :  { %v205_v37 = vmul.f32 1.442695, %v204_v36 }
 0x182   :  { %365 = vpow2.f32 %v205_v37 }
 0x18f   :  { %v366_v38 = vpop.eup %365 }
 0x190   :  { %v207_v39 = vsel %vm200_vm0, %v366_v38, 0.0 }
 0x191   :  { %208 = vadd.xlane.f32.xlu0 %v207_v39 }
 0x21a   :  { %v209_v45 = vpop.xlane.xlu0 %208 }
 0x21b   :  { %367 = vrcp.f32 %v209_v45 }
 0x228   :  { %v368_v46 = vpop.eup %367 }
 0x229   :  { %v211_v47 = vmul.f32 %v368_v46, %v366_v38 }
 0x22b   :  { %v212_v48 = vpack.c.bf16 %v211_v47, %v211_v47 }
 0x22d   :  { %317 = vmatmul.mubr.msk.bf16.vlgmr.msra.gmra.mxu1 %vm219_vm2, %v212_v48 }
 0x2ed   :  { %v264_v49 = vpop.f32.mrf.mxu1 }
 0x2ef   :  { %v266_v50 = vpop.f32.mrf.mxu1 }
 0x2f0   :  { %v273_v51 = vcombine.low %v264_v49, %v266_v50 }
 0x2f1   :  { %v268_v52 = vpop.f32.mrf.mxu1 }
 0x2f2   :  { %v280_v53 = vrot.slane %v273_v51, %v23_v19 }
 0x2f3   :  { %v269_v54 = vpop.f32.mrf.mxu1 }
 0x2f4   :  { %v282_v55 = vmul.f32 %v280_v53, %v16_v18 }
 0x2f6   :  { %283 = vst [vmem:[#allocation2] sm:$0xf] %v282_v55 }
 0x2f7   :  { %380 = shalt.err (!%p377_p4)
}
 0x2f8   :  { %293 = dma.vmem_to_hbm [thread:$0]  %s291_s19, 64, %s474_s3, [#allocation3]  }
 0x2f9   :  { %389 = dma.done.wait [#allocation3], 64  }
 0x2fa   :  { %390 = vsyncadd [#allocation3], 4294967232 }
 0x2fb   :  { %297 = vsyncpa [#allocation3], 1 }

</bundles_post_ra>
